<compile_context>
chip_gen: v7x
topology: tpu7x:2x2x1
jax: 0.10.0
libtpu: 0.0.40
codegen_flags: <defaults>
</compile_context>

<pallas_src>
import functools

import jax
import jax.numpy as jnp
import numpy as np
from jax import lax
from jax.experimental import pallas as pl
from jax.experimental.pallas import tpu as pltpu


def _attention_kernel(x_ref, wqkv_ref, wproj_ref, bias_ref, o_ref, *, num_heads, scale):
    """One grid step == one batch element. All matmuls + softmax fused in a single body."""
    _, N, C = x_ref.shape
    Dh = C // num_heads

    x = x_ref[0]                                                         # (N, C)

    # Fused QKV projection (qkv_bias=False): single lane-dense MXU matmul.
    qkv = jnp.dot(x, wqkv_ref[...], preferred_element_type=jnp.float32)  # (N, 3C)
    q_all = qkv[:, :C]
    k_all = qkv[:, C:2 * C]
    v_all = qkv[:, 2 * C:]

    # Per-head attention, statically unrolled (H small; static lane slices of width Dh).
    ctx_heads = []
    for h in range(num_heads):
        lo = h * Dh
        q_h = q_all[:, lo:lo + Dh]                                       # (N, Dh)
        k_h = k_all[:, lo:lo + Dh]                                       # (N, Dh)
        v_h = v_all[:, lo:lo + Dh]                                       # (N, Dh)

        # scores = (q @ k^T) * scale  (contract head-dim directly, no explicit transpose)
        s = lax.dot_general(q_h, k_h, (((1,), (1,)), ((), ())),
                            preferred_element_type=jnp.float32) * scale  # (N, N)

        # Numerically stable softmax over the last axis (matches torch.softmax).
        s = s - jnp.max(s, axis=-1, keepdims=True)
        p = jnp.exp(s)
        # approx=False keeps full f32 accuracy for the 1e-5 tolerance check; approx=True
        # (EUP vrcp) is the right choice once shapes grow and VALU becomes the bottleneck.
        p = p * pl.reciprocal(jnp.sum(p, axis=-1, keepdims=True), approx=False)
        # attn_drop is identity (p = 0.0)

        ctx_heads.append(jnp.dot(p, v_h, preferred_element_type=jnp.float32))  # (N, Dh)

    ctx = jnp.concatenate(ctx_heads, axis=-1)                            # (N, C)

    # Output projection + bias: one lane-dense (K = C) matmul instead of H tiny ones.
    y = jnp.dot(ctx, wproj_ref[...], preferred_element_type=jnp.float32) + bias_ref[...]
    # proj_drop is identity (p = 0.0)
    o_ref[0] = y.astype(o_ref.dtype)


def prepare_weights(wqkv, wproj, bproj):
    """One-time conversion from torch nn.Linear layout to the kernel's math layout.

    Done once at model load, NOT per forward call (keep layout plumbing out of the
    per-invocation path).
    """
    return wqkv.T, wproj.T, bproj.reshape(1, -1)      # (C, 3C), (C, C), (1, C)


def attention_pallas(x, wqkv_t, wproj_t, bias2d, *, num_heads, scale):
    """x: (B, N, C).  wqkv_t: (C, 3C).  wproj_t: (C, C).  bias2d: (1, C)."""
    B, N, C = x.shape
    Dh = C // num_heads

    kernel = functools.partial(_attention_kernel, num_heads=num_heads, scale=scale)

    # Advisory cost hint for XLA's scheduler around the custom call.
    flops = B * (2 * N * C * (3 * C)            # QKV projection
                 + num_heads * (2 * N * N * Dh  # q @ k^T
                                + 2 * N * N * Dh)  # p @ v
                 + 2 * N * C * C)               # output projection
    bytes_accessed = (x.size + wqkv_t.size + wproj_t.size + bias2d.size + x.size) * 4
    cost = pl.CostEstimate(flops=flops,
                           transcendentals=B * num_heads * N * N,   # exp()
                           bytes_accessed=bytes_accessed)

    return pl.pallas_call(
        kernel,
        out_shape=jax.ShapeDtypeStruct((B, N, C), x.dtype),
        grid=(B,),
        in_specs=[
            pl.BlockSpec((1, N, C), lambda b: (b, 0, 0)),      # x: one batch per step
            pl.BlockSpec((C, 3 * C), lambda b: (0, 0)),        # Wqkv^T: constant -> VMEM-resident
            pl.BlockSpec((C, C), lambda b: (0, 0)),            # Wproj^T: constant -> VMEM-resident
            pl.BlockSpec((1, C), lambda b: (0, 0)),            # proj bias: constant -> resident
        ],
        out_specs=pl.BlockSpec((1, N, C), lambda b: (b, 0, 0)),
        compiler_params=pltpu.CompilerParams(
            # Batch axis is fully independent -> megacore-shardable (v7x: 2 TCs, one batch each).
            dimension_semantics=("parallel",)),
        cost_estimate=cost,
    )(x, wqkv_t, wproj_t, bias2d)


def attention_ref(x, wqkv, wproj, bproj, *, num_heads, scale):
    """Pure-JAX reference mirroring the PyTorch forward pass (torch-layout weights)."""
    B, N, C = x.shape
    H = num_heads
    Dh = C // H
    qkv = x @ wqkv.T                                          # (B, N, 3C)
    qkv = qkv.reshape(B, N, 3, H, Dh).transpose(2, 0, 3, 1, 4)
    q, k, v = qkv[0], qkv[1], qkv[2]                          # (B, H, N, Dh)
    attn = jnp.einsum("bhnd,bhmd->bhnm", q, k) * scale
    attn = jax.nn.softmax(attn, axis=-1)
    out = jnp.einsum("bhnm,bhmd->bhnd", attn, v)
    out = out.transpose(0, 2, 1, 3).reshape(B, N, C)
    return out @ wproj.T + bproj


if __name__ == "__main__":
    # Small shapes consistent with the module: dim=C=32, num_heads=8 (head_dim=4).
    B, N, C = 2, 8, 32
    num_heads = 8
    head_dim = C // num_heads
    scale = head_dim ** (-0.5)

    key = jax.random.PRNGKey(0)
    kx, kqkv, kp, kb = jax.random.split(key, 4)

    x = jax.random.normal(kx, (B, N, C), dtype=jnp.float32)
    # Deterministic synthetic parameters (torch Linear shapes: (out_features, in_features)).
    bound = 1.0 / np.sqrt(C)
    wqkv = jax.random.uniform(kqkv, (3 * C, C), jnp.float32, -bound, bound)   # qkv_bias=False
    wproj = jax.random.uniform(kp, (C, C), jnp.float32, -bound, bound)
    bproj = jax.random.uniform(kb, (C,), jnp.float32, -bound, bound)

    # One-time weight layout prep (kept out of the per-call path).
    wqkv_t, wproj_t, bias2d = prepare_weights(wqkv, wproj, bproj)

    out = attention_pallas(x, wqkv_t, wproj_t, bias2d, num_heads=num_heads, scale=scale)
    out = jax.block_until_ready(out)

    ref = attention_ref(x, wqkv, wproj, bproj, num_heads=num_heads, scale=scale)
    np.testing.assert_allclose(np.asarray(out), np.asarray(ref), rtol=1e-5, atol=1e-5)

    print("KERNEL_OK")
</pallas_src>

<mosaic_0001>
module attributes {stable_mosaic.version = 11 : i64} {
  func.func @_attention_kernel(%arg0: i32, %arg1: memref<1x8x32xf32, #tpu.memory_space<vmem>>, %arg2: memref<32x96xf32, #tpu.memory_space<vmem>>, %arg3: memref<32x32xf32, #tpu.memory_space<vmem>>, %arg4: memref<1x32xf32, #tpu.memory_space<vmem>>, %arg5: memref<1x8x32xf32, #tpu.memory_space<vmem>>) attributes {dimension_semantics = [#tpu.dimension_semantics<parallel>], iteration_bounds = array<i64: 2>, scalar_prefetch = 0 : i64, scratch_operands = 0 : i64, tpu.core_type = #tpu.core_type<tc>, window_params = [{transform_indices = @transform_0, window_bounds = array<i64: 1, 8, 32>}, {pipeline_mode = #tpu.pipeline_mode<synchronous>, transform_indices = @transform_1, window_bounds = array<i64: 32, 96>}, {pipeline_mode = #tpu.pipeline_mode<synchronous>, transform_indices = @transform_2, window_bounds = array<i64: 32, 32>}, {pipeline_mode = #tpu.pipeline_mode<synchronous>, transform_indices = @transform_3, window_bounds = array<i64: 1, 32>}, {transform_indices = @transform_4, window_bounds = array<i64: 1, 8, 32>}]} {
    %c0 = arith.constant 0 : index
    %c0_0 = arith.constant 0 : index
    %c0_1 = arith.constant 0 : index
    %0 = vector.load %arg1[%c0, %c0_0, %c0_1] : memref<1x8x32xf32, #tpu.memory_space<vmem>>, vector<1x8x32xf32>
    %1 = vector.shape_cast %0 : vector<1x8x32xf32> to vector<8x32xf32>
    %c0_2 = arith.constant 0 : index
    %c0_3 = arith.constant 0 : index
    %2 = vector.load %arg2[%c0_2, %c0_3] : memref<32x96xf32, #tpu.memory_space<vmem>>, vector<32x96xf32>
    %cst = arith.constant dense<0.000000e+00> : vector<8x96xf32>
    %3 = tpu.matmul %1, %2, %cst {dimension_numbers = #tpu.dot_dimension_numbers<[1], [0], [0], [1], [0, 0, 1, 1], [], []>} : vector<8x32xf32>, vector<32x96xf32>, vector<8x96xf32> -> vector<8x96xf32>
    %4 = vector.extract_strided_slice %3 {offsets = [0, 0], sizes = [8, 32], strides = [1, 1]} : vector<8x96xf32> to vector<8x32xf32>
    %5 = vector.extract_strided_slice %3 {offsets = [0, 32], sizes = [8, 32], strides = [1, 1]} : vector<8x96xf32> to vector<8x32xf32>
    %6 = vector.extract_strided_slice %3 {offsets = [0, 64], sizes = [8, 32], strides = [1, 1]} : vector<8x96xf32> to vector<8x32xf32>
    %7 = vector.extract_strided_slice %4 {offsets = [0, 0], sizes = [8, 4], strides = [1, 1]} : vector<8x32xf32> to vector<8x4xf32>
    %8 = vector.extract_strided_slice %5 {offsets = [0, 0], sizes = [8, 4], strides = [1, 1]} : vector<8x32xf32> to vector<8x4xf32>
    %9 = vector.extract_strided_slice %6 {offsets = [0, 0], sizes = [8, 4], strides = [1, 1]} : vector<8x32xf32> to vector<8x4xf32>
    %cst_4 = arith.constant dense<0.000000e+00> : vector<8x8xf32>
    %10 = tpu.matmul %7, %8, %cst_4 {dimension_numbers = #tpu.dot_dimension_numbers<[1], [1], [0], [0], [0, 0, 1, 0], [], []>} : vector<8x4xf32>, vector<8x4xf32>, vector<8x8xf32> -> vector<8x8xf32>
    %cst_5 = arith.constant 5.000000e-01 : f32
    %11 = vector.broadcast %cst_5 : f32 to vector<8x8xf32>
    %12 = arith.mulf %10, %11 : vector<8x8xf32>
    %cst_6 = arith.constant dense<0xFF800000> : vector<8xf32>
    %13 = vector.multi_reduction <maximumf>, %12, %cst_6 [1] : vector<8x8xf32> to vector<8xf32>
    %14 = vector.shape_cast %13 : vector<8xf32> to vector<8x1xf32>
    %15 = vector.broadcast %14 : vector<8x1xf32> to vector<8x8xf32>
    %16 = arith.subf %12, %15 : vector<8x8xf32>
    %17 = math.exp %16 : vector<8x8xf32>
    %cst_7 = arith.constant dense<0.000000e+00> : vector<8xf32>
    %18 = vector.multi_reduction <add>, %17, %cst_7 [1] : vector<8x8xf32> to vector<8xf32>
    %19 = vector.shape_cast %18 : vector<8xf32> to vector<8x1xf32>
    %20 = tpu.reciprocal %19 : vector<8x1xf32> -> vector<8x1xf32>
    %21 = vector.broadcast %20 : vector<8x1xf32> to vector<8x8xf32>
    %22 = arith.mulf %17, %21 : vector<8x8xf32>
    %cst_8 = arith.constant dense<0.000000e+00> : vector<8x4xf32>
    %23 = tpu.matmul %22, %9, %cst_8 {dimension_numbers = #tpu.dot_dimension_numbers<[1], [0], [0], [1], [0, 0, 1, 1], [], []>} : vector<8x8xf32>, vector<8x4xf32>, vector<8x4xf32> -> vector<8x4xf32>
    %24 = vector.extract_strided_slice %4 {offsets = [0, 4], sizes = [8, 4], strides = [1, 1]} : vector<8x32xf32> to vector<8x4xf32>
    %25 = vector.extract_strided_slice %5 {offsets = [0, 4], sizes = [8, 4], strides = [1, 1]} : vector<8x32xf32> to vector<8x4xf32>
    %26 = vector.extract_strided_slice %6 {offsets = [0, 4], sizes = [8, 4], strides = [1, 1]} : vector<8x32xf32> to vector<8x4xf32>
    %cst_9 = arith.constant dense<0.000000e+00> : vector<8x8xf32>
    %27 = tpu.matmul %24, %25, %cst_9 {dimension_numbers = #tpu.dot_dimension_numbers<[1], [1], [0], [0], [0, 0, 1, 0], [], []>} : vector<8x4xf32>, vector<8x4xf32>, vector<8x8xf32> -> vector<8x8xf32>
    %cst_10 = arith.constant 5.000000e-01 : f32
    %28 = vector.broadcast %cst_10 : f32 to vector<8x8xf32>
    %29 = arith.mulf %27, %28 : vector<8x8xf32>
    %cst_11 = arith.constant dense<0xFF800000> : vector<8xf32>
    %30 = vector.multi_reduction <maximumf>, %29, %cst_11 [1] : vector<8x8xf32> to vector<8xf32>
    %31 = vector.shape_cast %30 : vector<8xf32> to vector<8x1xf32>
    %32 = vector.broadcast %31 : vector<8x1xf32> to vector<8x8xf32>
    %33 = arith.subf %29, %32 : vector<8x8xf32>
    %34 = math.exp %33 : vector<8x8xf32>
    %cst_12 = arith.constant dense<0.000000e+00> : vector<8xf32>
    %35 = vector.multi_reduction <add>, %34, %cst_12 [1] : vector<8x8xf32> to vector<8xf32>
    %36 = vector.shape_cast %35 : vector<8xf32> to vector<8x1xf32>
    %37 = tpu.reciprocal %36 : vector<8x1xf32> -> vector<8x1xf32>
    %38 = vector.broadcast %37 : vector<8x1xf32> to vector<8x8xf32>
    %39 = arith.mulf %34, %38 : vector<8x8xf32>
    %cst_13 = arith.constant dense<0.000000e+00> : vector<8x4xf32>
    %40 = tpu.matmul %39, %26, %cst_13 {dimension_numbers = #tpu.dot_dimension_numbers<[1], [0], [0], [1], [0, 0, 1, 1], [], []>} : vector<8x8xf32>, vector<8x4xf32>, vector<8x4xf32> -> vector<8x4xf32>
    %41 = vector.extract_strided_slice %4 {offsets = [0, 8], sizes = [8, 4], strides = [1, 1]} : vector<8x32xf32> to vector<8x4xf32>
    %42 = vector.extract_strided_slice %5 {offsets = [0, 8], sizes = [8, 4], strides = [1, 1]} : vector<8x32xf32> to vector<8x4xf32>
    %43 = vector.extract_strided_slice %6 {offsets = [0, 8], sizes = [8, 4], strides = [1, 1]} : vector<8x32xf32> to vector<8x4xf32>
    %cst_14 = arith.constant dense<0.000000e+00> : vector<8x8xf32>
    %44 = tpu.matmul %41, %42, %cst_14 {dimension_numbers = #tpu.dot_dimension_numbers<[1], [1], [0], [0], [0, 0, 1, 0], [], []>} : vector<8x4xf32>, vector<8x4xf32>, vector<8x8xf32> -> vector<8x8xf32>
    %cst_15 = arith.constant 5.000000e-01 : f32
    %45 = vector.broadcast %cst_15 : f32 to vector<8x8xf32>
    %46 = arith.mulf %44, %45 : vector<8x8xf32>
    %cst_16 = arith.constant dense<0xFF800000> : vector<8xf32>
    %47 = vector.multi_reduction <maximumf>, %46, %cst_16 [1] : vector<8x8xf32> to vector<8xf32>
    %48 = vector.shape_cast %47 : vector<8xf32> to vector<8x1xf32>
    %49 = vector.broadcast %48 : vector<8x1xf32> to vector<8x8xf32>
    %50 = arith.subf %46, %49 : vector<8x8xf32>
    %51 = math.exp %50 : vector<8x8xf32>
    %cst_17 = arith.constant dense<0.000000e+00> : vector<8xf32>
    %52 = vector.multi_reduction <add>, %51, %cst_17 [1] : vector<8x8xf32> to vector<8xf32>
    %53 = vector.shape_cast %52 : vector<8xf32> to vector<8x1xf32>
    %54 = tpu.reciprocal %53 : vector<8x1xf32> -> vector<8x1xf32>
    %55 = vector.broadcast %54 : vector<8x1xf32> to vector<8x8xf32>
    %56 = arith.mulf %51, %55 : vector<8x8xf32>
    %cst_18 = arith.constant dense<0.000000e+00> : vector<8x4xf32>
    %57 = tpu.matmul %56, %43, %cst_18 {dimension_numbers = #tpu.dot_dimension_numbers<[1], [0], [0], [1], [0, 0, 1, 1], [], []>} : vector<8x8xf32>, vector<8x4xf32>, vector<8x4xf32> -> vector<8x4xf32>
    %58 = vector.extract_strided_slice %4 {offsets = [0, 12], sizes = [8, 4], strides = [1, 1]} : vector<8x32xf32> to vector<8x4xf32>
    %59 = vector.extract_strided_slice %5 {offsets = [0, 12], sizes = [8, 4], strides = [1, 1]} : vector<8x32xf32> to vector<8x4xf32>
    %60 = vector.extract_strided_slice %6 {offsets = [0, 12], sizes = [8, 4], strides = [1, 1]} : vector<8x32xf32> to vector<8x4xf32>
    %cst_19 = arith.constant dense<0.000000e+00> : vector<8x8xf32>
    %61 = tpu.matmul %58, %59, %cst_19 {dimension_numbers = #tpu.dot_dimension_numbers<[1], [1], [0], [0], [0, 0, 1, 0], [], []>} : vector<8x4xf32>, vector<8x4xf32>, vector<8x8xf32> -> vector<8x8xf32>
    %cst_20 = arith.constant 5.000000e-01 : f32
    %62 = vector.broadcast %cst_20 : f32 to vector<8x8xf32>
    %63 = arith.mulf %61, %62 : vector<8x8xf32>
    %cst_21 = arith.constant dense<0xFF800000> : vector<8xf32>
    %64 = vector.multi_reduction <maximumf>, %63, %cst_21 [1] : vector<8x8xf32> to vector<8xf32>
    %65 = vector.shape_cast %64 : vector<8xf32> to vector<8x1xf32>
    %66 = vector.broadcast %65 : vector<8x1xf32> to vector<8x8xf32>
    %67 = arith.subf %63, %66 : vector<8x8xf32>
    %68 = math.exp %67 : vector<8x8xf32>
    %cst_22 = arith.constant dense<0.000000e+00> : vector<8xf32>
    %69 = vector.multi_reduction <add>, %68, %cst_22 [1] : vector<8x8xf32> to vector<8xf32>
    %70 = vector.shape_cast %69 : vector<8xf32> to vector<8x1xf32>
    %71 = tpu.reciprocal %70 : vector<8x1xf32> -> vector<8x1xf32>
    %72 = vector.broadcast %71 : vector<8x1xf32> to vector<8x8xf32>
    %73 = arith.mulf %68, %72 : vector<8x8xf32>
    %cst_23 = arith.constant dense<0.000000e+00> : vector<8x4xf32>
    %74 = tpu.matmul %73, %60, %cst_23 {dimension_numbers = #tpu.dot_dimension_numbers<[1], [0], [0], [1], [0, 0, 1, 1], [], []>} : vector<8x8xf32>, vector<8x4xf32>, vector<8x4xf32> -> vector<8x4xf32>
    %75 = vector.extract_strided_slice %4 {offsets = [0, 16], sizes = [8, 4], strides = [1, 1]} : vector<8x32xf32> to vector<8x4xf32>
    %76 = vector.extract_strided_slice %5 {offsets = [0, 16], sizes = [8, 4], strides = [1, 1]} : vector<8x32xf32> to vector<8x4xf32>
    %77 = vector.extract_strided_slice %6 {offsets = [0, 16], sizes = [8, 4], strides = [1, 1]} : vector<8x32xf32> to vector<8x4xf32>
    %cst_24 = arith.constant dense<0.000000e+00> : vector<8x8xf32>
    %78 = tpu.matmul %75, %76, %cst_24 {dimension_numbers = #tpu.dot_dimension_numbers<[1], [1], [0], [0], [0, 0, 1, 0], [], []>} : vector<8x4xf32>, vector<8x4xf32>, vector<8x8xf32> -> vector<8x8xf32>
    %cst_25 = arith.constant 5.000000e-01 : f32
    %79 = vector.broadcast %cst_25 : f32 to vector<8x8xf32>
    %80 = arith.mulf %78, %79 : vector<8x8xf32>
    %cst_26 = arith.constant dense<0xFF800000> : vector<8xf32>
    %81 = vector.multi_reduction <maximumf>, %80, %cst_26 [1] : vector<8x8xf32> to vector<8xf32>
    %82 = vector.shape_cast %81 : vector<8xf32> to vector<8x1xf32>
    %83 = vector.broadcast %82 : vector<8x1xf32> to vector<8x8xf32>
    %84 = arith.subf %80, %83 : vector<8x8xf32>
    %85 = math.exp %84 : vector<8x8xf32>
    %cst_27 = arith.constant dense<0.000000e+00> : vector<8xf32>
    %86 = vector.multi_reduction <add>, %85, %cst_27 [1] : vector<8x8xf32> to vector<8xf32>
    %87 = vector.shape_cast %86 : vector<8xf32> to vector<8x1xf32>
    %88 = tpu.reciprocal %87 : vector<8x1xf32> -> vector<8x1xf32>
    %89 = vector.broadcast %88 : vector<8x1xf32> to vector<8x8xf32>
    %90 = arith.mulf %85, %89 : vector<8x8xf32>
    %cst_28 = arith.constant dense<0.000000e+00> : vector<8x4xf32>
    %91 = tpu.matmul %90, %77, %cst_28 {dimension_numbers = #tpu.dot_dimension_numbers<[1], [0], [0], [1], [0, 0, 1, 1], [], []>} : vector<8x8xf32>, vector<8x4xf32>, vector<8x4xf32> -> vector<8x4xf32>
    %92 = vector.extract_strided_slice %4 {offsets = [0, 20], sizes = [8, 4], strides = [1, 1]} : vector<8x32xf32> to vector<8x4xf32>
    %93 = vector.extract_strided_slice %5 {offsets = [0, 20], sizes = [8, 4], strides = [1, 1]} : vector<8x32xf32> to vector<8x4xf32>
    %94 = vector.extract_strided_slice %6 {offsets = [0, 20], sizes = [8, 4], strides = [1, 1]} : vector<8x32xf32> to vector<8x4xf32>
    %cst_29 = arith.constant dense<0.000000e+00> : vector<8x8xf32>
    %95 = tpu.matmul %92, %93, %cst_29 {dimension_numbers = #tpu.dot_dimension_numbers<[1], [1], [0], [0], [0, 0, 1, 0], [], []>} : vector<8x4xf32>, vector<8x4xf32>, vector<8x8xf32> -> vector<8x8xf32>
    %cst_30 = arith.constant 5.000000e-01 : f32
    %96 = vector.broadcast %cst_30 : f32 to vector<8x8xf32>
    %97 = arith.mulf %95, %96 : vector<8x8xf32>
    %cst_31 = arith.constant dense<0xFF800000> : vector<8xf32>
    %98 = vector.multi_reduction <maximumf>, %97, %cst_31 [1] : vector<8x8xf32> to vector<8xf32>
    %99 = vector.shape_cast %98 : vector<8xf32> to vector<8x1xf32>
    %100 = vector.broadcast %99 : vector<8x1xf32> to vector<8x8xf32>
    %101 = arith.subf %97, %100 : vector<8x8xf32>
    %102 = math.exp %101 : vector<8x8xf32>
    %cst_32 = arith.constant dense<0.000000e+00> : vector<8xf32>
    %103 = vector.multi_reduction <add>, %102, %cst_32 [1] : vector<8x8xf32> to vector<8xf32>
    %104 = vector.shape_cast %103 : vector<8xf32> to vector<8x1xf32>
    %105 = tpu.reciprocal %104 : vector<8x1xf32> -> vector<8x1xf32>
    %106 = vector.broadcast %105 : vector<8x1xf32> to vector<8x8xf32>
    %107 = arith.mulf %102, %106 : vector<8x8xf32>
    %cst_33 = arith.constant dense<0.000000e+00> : vector<8x4xf32>
    %108 = tpu.matmul %107, %94, %cst_33 {dimension_numbers = #tpu.dot_dimension_numbers<[1], [0], [0], [1], [0, 0, 1, 1], [], []>} : vector<8x8xf32>, vector<8x4xf32>, vector<8x4xf32> -> vector<8x4xf32>
    %109 = vector.extract_strided_slice %4 {offsets = [0, 24], sizes = [8, 4], strides = [1, 1]} : vector<8x32xf32> to vector<8x4xf32>
    %110 = vector.extract_strided_slice %5 {offsets = [0, 24], sizes = [8, 4], strides = [1, 1]} : vector<8x32xf32> to vector<8x4xf32>
    %111 = vector.extract_strided_slice %6 {offsets = [0, 24], sizes = [8, 4], strides = [1, 1]} : vector<8x32xf32> to vector<8x4xf32>
    %cst_34 = arith.constant dense<0.000000e+00> : vector<8x8xf32>
    %112 = tpu.matmul %109, %110, %cst_34 {dimension_numbers = #tpu.dot_dimension_numbers<[1], [1], [0], [0], [0, 0, 1, 0], [], []>} : vector<8x4xf32>, vector<8x4xf32>, vector<8x8xf32> -> vector<8x8xf32>
    %cst_35 = arith.constant 5.000000e-01 : f32
    %113 = vector.broadcast %cst_35 : f32 to vector<8x8xf32>
    %114 = arith.mulf %112, %113 : vector<8x8xf32>
    %cst_36 = arith.constant dense<0xFF800000> : vector<8xf32>
    %115 = vector.multi_reduction <maximumf>, %114, %cst_36 [1] : vector<8x8xf32> to vector<8xf32>
    %116 = vector.shape_cast %115 : vector<8xf32> to vector<8x1xf32>
    %117 = vector.broadcast %116 : vector<8x1xf32> to vector<8x8xf32>
    %118 = arith.subf %114, %117 : vector<8x8xf32>
    %119 = math.exp %118 : vector<8x8xf32>
    %cst_37 = arith.constant dense<0.000000e+00> : vector<8xf32>
    %120 = vector.multi_reduction <add>, %119, %cst_37 [1] : vector<8x8xf32> to vector<8xf32>
    %121 = vector.shape_cast %120 : vector<8xf32> to vector<8x1xf32>
    %122 = tpu.reciprocal %121 : vector<8x1xf32> -> vector<8x1xf32>
    %123 = vector.broadcast %122 : vector<8x1xf32> to vector<8x8xf32>
    %124 = arith.mulf %119, %123 : vector<8x8xf32>
    %cst_38 = arith.constant dense<0.000000e+00> : vector<8x4xf32>
    %125 = tpu.matmul %124, %111, %cst_38 {dimension_numbers = #tpu.dot_dimension_numbers<[1], [0], [0], [1], [0, 0, 1, 1], [], []>} : vector<8x8xf32>, vector<8x4xf32>, vector<8x4xf32> -> vector<8x4xf32>
    %126 = vector.extract_strided_slice %4 {offsets = [0, 28], sizes = [8, 4], strides = [1, 1]} : vector<8x32xf32> to vector<8x4xf32>
    %127 = vector.extract_strided_slice %5 {offsets = [0, 28], sizes = [8, 4], strides = [1, 1]} : vector<8x32xf32> to vector<8x4xf32>
    %128 = vector.extract_strided_slice %6 {offsets = [0, 28], sizes = [8, 4], strides = [1, 1]} : vector<8x32xf32> to vector<8x4xf32>
    %cst_39 = arith.constant dense<0.000000e+00> : vector<8x8xf32>
    %129 = tpu.matmul %126, %127, %cst_39 {dimension_numbers = #tpu.dot_dimension_numbers<[1], [1], [0], [0], [0, 0, 1, 0], [], []>} : vector<8x4xf32>, vector<8x4xf32>, vector<8x8xf32> -> vector<8x8xf32>
    %cst_40 = arith.constant 5.000000e-01 : f32
    %130 = vector.broadcast %cst_40 : f32 to vector<8x8xf32>
    %131 = arith.mulf %129, %130 : vector<8x8xf32>
    %cst_41 = arith.constant dense<0xFF800000> : vector<8xf32>
    %132 = vector.multi_reduction <maximumf>, %131, %cst_41 [1] : vector<8x8xf32> to vector<8xf32>
    %133 = vector.shape_cast %132 : vector<8xf32> to vector<8x1xf32>
    %134 = vector.broadcast %133 : vector<8x1xf32> to vector<8x8xf32>
    %135 = arith.subf %131, %134 : vector<8x8xf32>
    %136 = math.exp %135 : vector<8x8xf32>
    %cst_42 = arith.constant dense<0.000000e+00> : vector<8xf32>
    %137 = vector.multi_reduction <add>, %136, %cst_42 [1] : vector<8x8xf32> to vector<8xf32>
    %138 = vector.shape_cast %137 : vector<8xf32> to vector<8x1xf32>
    %139 = tpu.reciprocal %138 : vector<8x1xf32> -> vector<8x1xf32>
    %140 = vector.broadcast %139 : vector<8x1xf32> to vector<8x8xf32>
    %141 = arith.mulf %136, %140 : vector<8x8xf32>
    %cst_43 = arith.constant dense<0.000000e+00> : vector<8x4xf32>
    %142 = tpu.matmul %141, %128, %cst_43 {dimension_numbers = #tpu.dot_dimension_numbers<[1], [0], [0], [1], [0, 0, 1, 1], [], []>} : vector<8x8xf32>, vector<8x4xf32>, vector<8x4xf32> -> vector<8x4xf32>
    %143 = tpu.concatenate %23, %40, %57, %74, %91, %108, %125, %142 in 1 : vector<8x4xf32>, vector<8x4xf32>, vector<8x4xf32>, vector<8x4xf32>, vector<8x4xf32>, vector<8x4xf32>, vector<8x4xf32>, vector<8x4xf32> -> vector<8x32xf32>
    %c0_44 = arith.constant 0 : index
    %c0_45 = arith.constant 0 : index
    %144 = vector.load %arg3[%c0_44, %c0_45] : memref<32x32xf32, #tpu.memory_space<vmem>>, vector<32x32xf32>
    %cst_46 = arith.constant dense<0.000000e+00> : vector<8x32xf32>
    %145 = tpu.matmul %143, %144, %cst_46 {dimension_numbers = #tpu.dot_dimension_numbers<[1], [0], [0], [1], [0, 0, 1, 1], [], []>} : vector<8x32xf32>, vector<32x32xf32>, vector<8x32xf32> -> vector<8x32xf32>
    %c0_47 = arith.constant 0 : index
    %c0_48 = arith.constant 0 : index
    %146 = vector.load %arg4[%c0_47, %c0_48] : memref<1x32xf32, #tpu.memory_space<vmem>>, vector<1x32xf32>
    %147 = vector.broadcast %146 : vector<1x32xf32> to vector<8x32xf32>
    %148 = arith.addf %145, %147 : vector<8x32xf32>
    %c0_49 = arith.constant 0 : index
    %c0_50 = arith.constant 0 : index
    %c0_51 = arith.constant 0 : index
    %149 = vector.load %arg5[%c0_49, %c0_50, %c0_51] : memref<1x8x32xf32, #tpu.memory_space<vmem>>, vector<1x8x32xf32>
    %150 = vector.shape_cast %149 : vector<1x8x32xf32> to vector<8x32xf32>
    %151 = vector.shape_cast %148 : vector<8x32xf32> to vector<1x8x32xf32>
    tpu.vector_store %arg5[%c0_49, %c0_50, %c0_51], %151 {strides = array<i32>} : memref<1x8x32xf32, #tpu.memory_space<vmem>>, vector<1x8x32xf32>,
    return
  }
  func.func @transform_0(%arg0: i32) -> (i32, i32, i32) {
    %c0_i32 = arith.constant 0 : i32
    %c0_i32_0 = arith.constant 0 : i32
    %c0_i32_1 = arith.constant 0 : i32
    return %arg0, %c0_i32, %c0_i32_0 : i32, i32, i32
  }
  func.func @transform_1(%arg0: i32) -> (i32, i32) {
    %c0_i32 = arith.constant 0 : i32
    %c0_i32_0 = arith.constant 0 : i32
    %c0_i32_1 = arith.constant 0 : i32
    return %c0_i32, %c0_i32_0 : i32, i32
  }
  func.func @transform_2(%arg0: i32) -> (i32, i32) {
    %c0_i32 = arith.constant 0 : i32
    %c0_i32_0 = arith.constant 0 : i32
    %c0_i32_1 = arith.constant 0 : i32
    return %c0_i32, %c0_i32_0 : i32, i32
  }
  func.func @transform_3(%arg0: i32) -> (i32, i32) {
    %c0_i32 = arith.constant 0 : i32
    %c0_i32_0 = arith.constant 0 : i32
    %c0_i32_1 = arith.constant 0 : i32
    return %c0_i32, %c0_i32_0 : i32, i32
  }
  func.func @transform_4(%arg0: i32) -> (i32, i32, i32) {
    %c0_i32 = arith.constant 0 : i32
    %c0_i32_0 = arith.constant 0 : i32
    %c0_i32_1 = arith.constant 0 : i32
    return %arg0, %c0_i32, %c0_i32_0 : i32, i32, i32
  }
}

</mosaic_0001>

<bundles_post_ra>
// kernel: tpu_custom_call.1
= control target key start
LH: loop header
LB: loop body
LE: loop exit
PB: predicated region body
PF: predicated region fallthrough
CT: control target
= control target key end

     0   :  { %9 = vsyncpa [#allocation3], 0  ;;  %s2829_s0 = inlined_call_operand.hbm [shape: f32[2,8,32], index: 0, kind: input, shape index: {}]   ;;  %s2830_s1 = inlined_call_operand.hbm [shape: f32[32,96], index: 1, kind: input, shape index: {}]   ;;  %s2831_s2 = inlined_call_operand.hbm [shape: f32[32,32], index: 2, kind: input, shape index: {}]   ;;  %s2832_s3 = inlined_call_operand.vmem [shape: f32[1,32], index: 3, kind: input, shape index: {}]   ;;  %s2833_s4 = inlined_call_operand.hbm [shape: f32[2,8,32], index: 4, kind: output, shape index: {}]  }
   0x1   :  { %11 = vsyncpa [#allocation3 + $0x1], 0 }
   0x2   :  { %12 = vsyncpa [#allocation6], 0 }
   0x3   :  { %13 = vsyncpa [#allocation4], 0 }
   0x4   :  { %15 = vsyncpa [#allocation4 + $0x1], 0  ;;  %s2433_s15 = smov 0   ;;  %s2435_s16 = smov 0  }
   0x5   :  { %s2437_s17 = smov 0   ;;  %s2439_s18 = smov 0  }
   0x6 LB: > { %s2454_s19 = sadd.s32 4294967295, %s2367_s18   ;;  %s1878_s20 = sadd.s32 4294967294, %s2367_s18   ;;  %s2367_s18 = sphi %s2439_s18, %s2853_s18   ;;  %s2363_s17 = sphi %s2437_s17, %s2852_s17   ;;  %s2359_s16 = sphi %s2435_s16, %s2851_s16   ;;  %s2355_s15 = sphi %s2433_s15, %s2850_s15  }
   0x7   : > { %p41_p0 = scmp.ne.s32.totalorder %s2359_s16, %s2355_s15  ;;  %p2834_p1 = scmp.eq.s32.totalorder %s2454_s19, 0 }
   0x8   : > { %p134_p3 = scmp.eq.s32.totalorder %s1878_s20, 1  ;;  %p1879_p5 = scmp.ge.s32.totalorder %s2367_s18, 1 }
   0x9   : > { %p2463_p4 = por %p2834_p1, %p41_p0  ;;  %p141_p7 = scmp.lt.s32.totalorder %s2367_s18, 3 }
   0xa   : > { %p2468_p6 = por %p134_p3, %p41_p0  ;;  %s2369_s24 = smov [#allocation5]  }
   0xb   : > { %s2837_s21 = scalar_select %p2463_p4, 1, 0 }
   0xc   : > { %s2838_s22 = scalar_select %p2468_p6, 1, 0 }
   0xd   : > { %p2473_p8 = pnand %p1879_p5, %p141_p7  ;;  %s153_s25 = sshll.u32 %s2369_s24, 4  ;;  %s2477_s25 = int_to_ptr.vmem [resolvable:$true] %s153_s25 }
   0xe   : > { %s2370_s27 = smov [#allocation7]   ;;  %s2211_s5 = scalar_lea.hbm %s2830_s1, 512 }
   0xf   : > { %p2089_p9 = pneg %p2473_p8  ;;  %s166_s28 = sshll.u32 %s2370_s27, 4  ;;  %s2488_s28 = int_to_ptr.vmem [resolvable:$true] %s166_s28 }
  0x10   : > { %p2212_p12 = scmp.ne.s32.totalorder %s2830_s1, %s2211_s5  ;;  %p2218_p5 = scmp.lt.u32.totalorder %s2211_s5, %s2830_s1 }
  0x11   : > { %p2484_p11 = pnand %p2089_p9, %p2834_p1 }
  0x13   : > { %p2213_p13 = pneg %p2484_p11 }
  0x15   : > { %p2214_p0 = pnand %p2213_p13, %p2212_p12 }
  0x17   : > { %p2215_p3 = pneg %p2214_p0 }
  0x19   : > { %p2220_p7 = pnand %p2218_p5, %p2215_p3 }
  0x1b   : > { %2223 = shalt.err (!%p2220_p7)
}
  0x1c   : > { %s2224_s10 = scalar_lea.vmem %s2477_s25, 512  ;;  %p2232_p2 = scmp.lt.s32.totalorder %s2477_s25, %s2477_s25 }
  0x1d   : > { %p2225_p9 = scmp.ne.s32.totalorder %s2477_s25, %s2224_s10  ;;  %p2233_p12 = scmp.lt.s32.totalorder %s2224_s10, %s2224_s10 }
  0x1f   : > { %p2227_p10 = pnand %p2225_p9, %p2213_p13  ;;  %p2234_p0 = por %p2233_p12, %p2232_p2 }
  0x21   : > { %p2228_p1 = pneg %p2227_p10 }
  0x23   : > { %p2235_p6 = pnand %p2234_p0, %p2228_p1 }
  0x25   : > { %2238 = shalt.err (!%p2235_p6)
}
  0x26   : > { %s2371_s11 = smov 128   ;;  %s2372_s12 = smov 8  }
  0x27   : > { %2092 = dma.hbm_to_vmem [thread:$0]  (!%p2484_p11), %s2830_s1, 512, %s2477_s25, [#allocation6], %s2371_s11, %s2371_s11, %s2372_s12  }
  0x28   : > { %s2239_s27 = scalar_lea.hbm %s2831_s2, 512 }
  0x29   : > { %p2240_p2 = scmp.ne.s32.totalorder %s2831_s2, %s2239_s27  ;;  %p2246_p10 = scmp.lt.u32.totalorder %s2239_s27, %s2831_s2 }
  0x2b   : > { %p2242_p1 = pnand %p2240_p2, %p2213_p13 }
  0x2d   : > { %p2243_p6 = pneg %p2242_p1 }
  0x2f   : > { %p2248_p3 = pnand %p2246_p10, %p2243_p6 }
  0x31   : > { %2251 = shalt.err (!%p2248_p3)
}
  0x32   : > { %s2252_s25 = scalar_lea.vmem %s2488_s28, 512  ;;  %p2260_p12 = scmp.lt.s32.totalorder %s2488_s28, %s2488_s28 }
  0x33   : > { %p2253_p5 = scmp.ne.s32.totalorder %s2488_s28, %s2252_s25  ;;  %p2261_p0 = scmp.lt.s32.totalorder %s2252_s25, %s2252_s25 }
  0x35   : > { %p2255_p7 = pnand %p2253_p5, %p2213_p13  ;;  %p2262_p2 = por %p2261_p0, %p2260_p12 }
  0x37   : > { %p2256_p9 = pneg %p2255_p7 }
  0x39   : > { %p2263_p1 = pnand %p2262_p2, %p2256_p9 }
  0x3b   : > { %2266 = shalt.err (!%p2263_p1)
}
  0x3c   : > { %2095 = dma.hbm_to_vmem [thread:$0]  (!%p2484_p11), %s2831_s2, 512, %s2488_s28, [#allocation6], %s2371_s11, %s2371_s11, %s2372_s12  }
  0x3d   : > { %s2543_s9 = sadd.s32 1, %s2367_s18   ;;  %s28_s26 = sadd.s32 1, %s2363_s17 }
  0x3e   : > { %s25_s10 = ssub.s32 %s2367_s18, %s2543_s9  ;;  %p35_p13 = scmp.ne.s32.totalorder %s2363_s17, %s2359_s16 }
  0x3f   : > { %p26_p6 = scmp.eq.s32.totalorder %s25_s10, 0  ;;  %p36_p10 = scmp.eq.s32.totalorder %s2367_s18, 0 }
  0x40   : > { %p2841_p3 = scmp.eq.s32.totalorder %s2454_s19, 1  ;;  %p2106_p7 = scmp.lt.s32.totalorder %s2367_s18, 2 }
  0x41   : > { %s2559_s14 = scalar_select %p26_p6, %s2363_s17, %s28_s26  }
  0x42   : > { %p2553_p5 = por %p2841_p3, %p35_p13  ;;  %p37_p9 = por %p36_p10, %p35_p13 }
  0x43   : > { %s183_s20 = sand.u32 1, %s2363_s17   ;;  %s1884_s28 = sshll.u32 %s2367_s18, 7 }
  0x44   : > { %s2842_s13 = scalar_select %p2553_p5, 1, 0 }
  0x45   : > { %s1883_s24 = sshll.u32 %s183_s20, 3  ;;  %s2566_s27 = scalar_lea.hbm %s2829_s0, %s1884_s28 }
  0x46   : > { %s187_s29 = scalar_lea.vmem [#allocation2], %s1883_s24  ;;  %p2570_p11 = pnand %p2106_p7, %p37_p9 }
  0x47   : > { %s194_s30 = sshll.u32 %s187_s29, 4  ;;  %s184_s6 = scalar_lea.sflag [#allocation3], %s183_s20  ;;  %s2568_s30 = int_to_ptr.vmem [resolvable:$true] %s194_s30 }
  0x48   : > { %s2267_s25 = scalar_lea.hbm %s2566_s27, 128  ;;  %p2269_p0 = pneg %p2570_p11 }
  0x49   : > { %p2268_p12 = scmp.ne.s32.totalorder %s2566_s27, %s2267_s25  ;;  %s2272_s26 = scalar_lea.hbm %s2829_s0, 256 }
  0x4a   : > { %p2273_p13 = scmp.lt.u32.totalorder %s2566_s27, %s2829_s0  ;;  %p2274_p6 = scmp.lt.u32.totalorder %s2272_s26, %s2267_s25 }
  0x4b   : > { %p2270_p2 = pnand %p2269_p0, %p2268_p12  ;;  %p2276_p3 = scmp.lt.u32.totalorder %s2267_s25, %s2566_s27 }
  0x4c   : > { %p2275_p10 = por %p2274_p6, %p2273_p13 }
  0x4d   : > { %p2271_p1 = pneg %p2270_p2 }
  0x4e   : > { %p2277_p7 = por %p2276_p3, %p2275_p10 }
  0x50   : > { %p2278_p9 = pnand %p2277_p7, %p2271_p1 }
  0x52   : > { %2281 = shalt.err (!%p2278_p9)
}
  0x53   : > { %s2282_s20 = scalar_lea.vmem %s2568_s30, 128  ;;  %s2373_s28 = smov [#allocation2]  }
  0x54   : > { %p2283_p12 = scmp.ne.s32.totalorder %s2568_s30, %s2282_s20  ;;  %s2287_s11 = sshll.u32 %s2373_s28, 4  ;;  %s2288_s11 = int_to_ptr.vmem [resolvable:$false] %s2287_s11 }
  0x55   : > { %s2289_s12 = scalar_lea.vmem %s2288_s11, 256  ;;  %p2290_p4 = scmp.lt.s32.totalorder %s2568_s30, %s2288_s11 }
  0x56   : > { %p2285_p2 = pnand %p2283_p12, %p2269_p0  ;;  %p2291_p13 = scmp.lt.s32.totalorder %s2289_s12, %s2282_s20 }
  0x58   : > { %p2286_p5 = pneg %p2285_p2  ;;  %p2292_p6 = por %p2291_p13, %p2290_p4 }
  0x5a   : > { %p2293_p10 = pnand %p2292_p6, %p2286_p5 }
  0x5c   : > { %2296 = shalt.err (!%p2293_p10)
}
  0x5d   : > { %2099 = dma.hbm_to_vmem [thread:$0]  (!%p2570_p11), %s2566_s27, 128, %s2568_s30, %s184_s6  }
  0x5e   : > { %203 = sbr.rel (%p2473_p8) target bundleno = 2101 (0x835), region = 36  ;;  %s2602_s29 = sand.u32 (!%p2473_p8), 1, %s2359_s16  }
  0x5f   : > { %s1886_s25 = sshll.u32 (!%p2473_p8), %s2602_s29, 3  ;;  %s206_s7 = scalar_lea.sflag (!%p2473_p8), [#allocation3], %s2602_s29 }
  0x60   : > { %s209_s8 = scalar_lea.vmem (!%p2473_p8), [#allocation2], %s1886_s25  ;;  %p2844_p4 = scmp.ne.s32.totalorder (!%p2473_p8), %s2837_s21, 0 }
  0x65   : > { %2342 = dma.done.wait (%p2844_p4), %s206_s7, 128  }
  0x66   : > { %2344 = vsyncadd (%p2844_p4), %s206_s7, 4294967168  ;;  %p2845_p5 = scmp.eq.s32.totalorder %s2454_s19, 0 }
  0x68   : > { %2346 = dma.done.wait (%p2845_p5), [#allocation6], 1024   ;;  %p2846_p8 = pmov %p2845_p5 }
  0x69   : > { %v2374_v0 = vmov 0.0|0.0   ;;  %vm2375_vm0 = vmmov 0   ;;  %v2376_v1 = vmov 0.0   ;;  %v243_v2 = vld [vmem:[#allocation5] sm:$0xff]  ;;  %v244_v3 = vld [vmem:[#allocation5 + $0x8] sm:$0xff]  ;;  %v245_v4 = vld [vmem:[#allocation5 + $0x10] sm:$0xff] }
  0x6a   : > { %2348 = vsyncadd (%p2846_p8), [#allocation6], 4294966272  ;;  %2065 = vmatprep.subr.bf16.mxu0 %v2374_v0  ;;  %1971 = vmatprep.mubr.msk.f32.mxu0 %vm2375_vm0, %v2376_v1  ;;  %v2066_v5 = vpack.c.bf16 %v244_v3, %v243_v2  ;;  %v246_v6 = vld [vmem:[#allocation5 + $0x18] sm:$0xff]  ;;  %vm247_vm1 = vcmask 261120   ;;  %s2377_s21 = smov 64   ;;  %s2378_s23 = smov 96  }
  0x6b   : > { %1974 = vmatprep.subr.mxu1 %v2376_v1  ;;  %1976 = vmatprep.mubr.msk.f32.mxu1 %vm2375_vm0, %v2376_v1  ;;  %v2069_v7 = vpack.c.bf16 %v246_v6, %v245_v4  ;;  %v242_v8 = vld [vmem:[%s209_s8] sm:$0xff]  ;;  %s2379_s27 = smov 92   ;;  %s2380_s30 = smov 124   ;;  %vm324_vm2 = vcmask 31744   ;;  %vm400_vm3 = vcmask 64512   ;;  %vm1680_vm4 = vcmask 97280  }
  0x6c   : > { %2067 = vmatpush3.bf16.msra.mxu0 %v2066_v5  ;;  %s2381_s5 = smov 88   ;;  %s2382_s6 = smov 120   ;;  %vm1682_vm5 = vcmask 130048   ;;  %vm1684_vm6 = vcmask 162816   ;;  %vm1686_vm7 = vcmask 195584   ;;  %vm1688_vm8 = vcmask 228352  }
  0x6d   : > { %2068 = vmatprep.subr.bf16.mxu0 %v2374_v0  ;;  %s2383_s26 = smov 116   ;;  %s2384_s10 = smov 84  }
  0x6e   : > { %s2385_s24 = smov 72   ;;  %s2386_s20 = smov 68  }
  0x6f   : > { %s2387_s28 = smov 80   ;;  %s2388_s11 = smov 112  }
  0x70   : > { %2070 = vmatpush3.bf16.msra.mxu0 %v2069_v7  ;;  %s2389_s12 = smov 76   ;;  %s2390_s7 = smov 108  }
  0x71   : > { %1994 = vmatprep.subr.mxu0 %v2376_v1  ;;  %s2391_s8 = smov 104   ;;  %p2847_p0 = scmp.ne.s32.totalorder %s2842_s13, 0 }
  0x73   : > { %1972 = vmatmul.mubr.msk.f32.vlgmr.msra.gmra.mrb[0].mxu0 %vm247_vm1, %v242_v8 }
  0x74   : > { %1996 = vmatprep.mubr.msk.f32.mxu0 %vm2375_vm0, %v2376_v1 }
 0x146   : > { %v2627_v9 = vpop.f32.mrb[0].mxu0 }
 0x147   : > { %412 = vrot.lane.b32.xlu1 %v2627_v9, %s2377_s21  ;;  %322 = vrot.lane.b32.xlu0 %v2627_v9, %s2378_s23  ;;  %v1973_v10 = vpop.f32.mrb[1].mxu0  ;;  %s2392_s21 = smov 100   ;;  %s2393_s23 = smov 60  }
 0x14b   : > { %490 = vrot.lane.b32.xlu1 %v2627_v9, %s2379_s27  ;;  %s2394_s27 = smov 52  }
 0x14f   : > { %488 = vrot.lane.b32.xlu1 %v2627_v9, %s2380_s30  ;;  %s2395_s30 = smov 48  }
 0x153   : > { %656 = vrot.lane.b32.xlu1 %v2627_v9, %s2381_s5  ;;  %s2396_s5 = smov 56  }
 0x157   : > { %654 = vrot.lane.b32.xlu1 %v2627_v9, %s2382_s6  ;;  %s2397_s6 = smov 40  }
 0x15b   : > { %820 = vrot.lane.b32.xlu1 %v2627_v9, %s2383_s26  ;;  %s2398_s26 = smov 44  }
 0x1b9   : > { %v413_v11 = vpop.permute.xlu1 %412  ;;  %v323_v12 = vpop.permute.xlu0 %322 }
 0x1ba   : > { %1975 = vmatpush3.xpose.msk.msra.mxu1 %vm324_vm2, %v323_v12 }
 0x1bb   : > { %1979 = vmatprep.subr.mxu1 %v2376_v1 }
 0x1bd   : > { %v2638_v13 = vpop.permute.xlu1 %490  ;;  %1977 = vmatmul.mubr.msk.f32.vlgmr.msra.gmra.mrb[0].mxu1 %vm324_vm2, %v2627_v9 }
 0x1be   : > { %1980 = vmatpush3.msra.mxu1 %v413_v11  ;;  %1981 = vmatprep.mubr.msk.f32.mxu1 %vm2375_vm0, %v2376_v1 }
 0x1bf   : > { %1984 = vmatprep.subr.mxu1 %v2376_v1 }
 0x1c1   : > { %v2645_v14 = vpop.permute.xlu1 %488 }
 0x1c5   : > { %v657_v15 = vpop.permute.xlu1 %656 }
 0x1c6   : > { %1995 = vmatpush3.xpose.msk.msra.mxu0 %vm324_vm2, %v657_v15 }
 0x1c7   : > { %2004 = vmatprep.subr.mxu0 %v2376_v1 }
 0x1c9   : > { %v655_v16 = vpop.permute.xlu1 %654 }
 0x1ca   : > { %1997 = vmatmul.mubr.msk.f32.vlgmr.msra.gmra.mrb[2].mxu0 %vm324_vm2, %v655_v16 }
 0x1cb   : > { %2006 = vmatprep.mubr.msk.f32.mxu0 %vm2375_vm0, %v2376_v1 }
 0x1cd   : > { %v821_v27 = vpop.permute.xlu1 %820 }
 0x290   : > { %v395_v17 = vpop.f32.mrb[0].mxu1 }
 0x291   : > { %v399_v18 = vmul.f32 0.5, %v395_v17  ;;  %v1978_v19 = vpop.f32.mrb[1].mxu1 }
 0x293   : > { %v401_v20 = vsel %vm400_vm3, %v399_v18, -inf }
 0x294   : > { %402 = vmax.xlane.f32.xlu0 %v401_v20 }
 0x29d   : > { %v728_v21 = vpop.f32.mrb[2].mxu0 }
 0x29e   : > { %v1998_v22 = vpop.f32.mrb[3].mxu0  ;;  %v732_v30 = vmul.f32 0.5, %v728_v21 }
 0x2a0   : > { %v733_v31 = vsel %vm400_vm3, %v732_v30, -inf }
 0x2aa   : > { %822 = vrot.lane.b32.xlu0 %v2627_v9, %s2384_s10  ;;  %s2399_s10 = smov 36  }
 0x2ae   : > { %1320 = vrot.lane.b32.xlu0 %v2627_v9, %s2385_s24  ;;  %s2400_s24 = smov 4  }
 0x2b2   : > { %1486 = vrot.lane.b32.xlu0 %v2627_v9, %s2386_s20  ;;  %s2401_s20 = smov 8  }
 0x321   : > { %v403_v23 = vpop.xlane.xlu0 %402 }
 0x322   : > { %v404_v24 = vsub.f32 %v399_v18, %v403_v23 }
 0x324   : > { %v405_v25 = vmul.f32 1.442695, %v404_v24 }
 0x325   : > { %v823_v26 = vpop.permute.xlu0 %822 }
 0x326   : > { %2179 = vpow2.f32 %v405_v25  ;;  %2005 = vmatpush3.xpose.msk.msra.mxu0 %vm324_vm2, %v823_v26 }
 0x327   : > { %2014 = vmatprep.subr.mxu0 %v2376_v1 }
 0x329   : > { %2007 = vmatmul.mubr.msk.f32.vlgmr.msra.gmra.mrb[4].mxu0 %vm324_vm2, %v821_v27  ;;  %v1321_v38 = vpop.permute.xlu0 %1320 }
 0x32a   : > { %2016 = vmatprep.mubr.msk.f32.mxu0 %vm2375_vm0, %v2376_v1 }
 0x32d   : > { %v1487_v41 = vpop.permute.xlu0 %1486 }
 0x330   : > { %v2180_v28 = vpop.eup %2179 }
 0x331   : > { %v407_v29 = vsel %vm400_vm3, %v2180_v28, 0.0 }
 0x332   : > { %408 = vadd.xlane.f32.xlu1 %v407_v29 }
 0x343   : > { %988 = vrot.lane.b32.xlu1 %v2627_v9, %s2387_s28  ;;  %s2402_s28 = smov 12  }
 0x347   : > { %986 = vrot.lane.b32.xlu1 %v2627_v9, %s2388_s11  ;;  %s2403_s11 = smov 16  }
 0x34b   : > { %1154 = vrot.lane.b32.xlu1 %v2627_v9, %s2389_s12  ;;  %s2404_s12 = smov 20  }
 0x34f   : > { %1152 = vrot.lane.b32.xlu1 %v2627_v9, %s2390_s7  ;;  %s2405_s7 = smov 24  }
 0x353   : > { %1318 = vrot.lane.b32.xlu1 %v2627_v9, %s2391_s8  ;;  %s2406_s8 = smov 28  }
 0x357   : > { %1484 = vrot.lane.b32.xlu1 %v2627_v9, %s2392_s21 }
 0x37b   : > { %734 = vmax.xlane.f32.xlu1 %v733_v31 }
 0x3bf   : > { %v409_v32 = vpop.xlane.xlu1 %408 }
 0x3c0   : > { %2181 = vrcp.f32 %v409_v32 }
 0x3c3   : > { %v989_v33 = vpop.permute.xlu1 %988 }
 0x3c4   : > { %2015 = vmatpush3.xpose.msk.msra.mxu0 %vm324_vm2, %v989_v33 }
 0x3c5   : > { %2024 = vmatprep.subr.mxu0 %v2376_v1 }
 0x3c7   : > { %v987_v34 = vpop.permute.xlu1 %986 }
 0x3c8   : > { %2017 = vmatmul.mubr.msk.f32.vlgmr.msra.gmra.mrb[6].mxu0 %vm324_vm2, %v987_v34 }
 0x3c9   : > { %2026 = vmatprep.mubr.msk.f32.mxu0 %vm2375_vm0, %v2376_v1 }
 0x3ca   : > { %v2182_v35 = vpop.eup %2181 }
 0x3cb   : > { %v411_v36 = vmul.f32 %v2182_v35, %v2180_v28  ;;  %v1155_v37 = vpop.permute.xlu1 %1154 }
 0x3cc   : > { %2025 = vmatpush3.xpose.msk.msra.mxu0 %vm324_vm2, %v1155_v37 }
 0x3cd   : > { %1982 = vmatmul.mubr.msk.f32.vlgmr.msra.gmra.mrb[2].mxu1 %vm400_vm3, %v411_v36  ;;  %2034 = vmatprep.subr.mxu0 %v2376_v1 }
 0x3ce   : > { %1985 = vmatpush3.xpose.msk.msra.mxu1 %vm324_vm2, %v2638_v13  ;;  %1986 = vmatprep.mubr.msk.f32.mxu1 %vm2375_vm0, %v2376_v1 }
 0x3cf   : > { %v1153_v39 = vpop.permute.xlu1 %1152  ;;  %1989 = vmatprep.subr.mxu1 %v2376_v1 }
 0x3d0   : > { %2027 = vmatmul.mubr.msk.f32.vlgmr.msra.gmra.mrb[8].mxu0 %vm324_vm2, %v1153_v39 }
 0x3d1   : > { %2035 = vmatpush3.xpose.msk.msra.mxu0 %vm324_vm2, %v1321_v38  ;;  %1987 = vmatmul.mubr.msk.f32.vlgmr.msra.gmra.mrb[4].mxu1 %vm324_vm2, %v2645_v14 }
 0x3d2   : > { %2036 = vmatprep.mubr.msk.f32.mxu0 %vm2375_vm0, %v2376_v1  ;;  %2044 = vmatprep.subr.mxu0 %v2376_v1 }
 0x3d3   : > { %v1319_v40 = vpop.permute.xlu1 %1318  ;;  %1991 = vmatprep.mubr.msk.f32.mxu1 %vm2375_vm0, %v2376_v1 }
 0x3d4   : > { %2037 = vmatmul.mubr.msk.f32.vlgmr.msra.gmra.mrb[10].mxu0 %vm324_vm2, %v1319_v40 }
 0x3d5   : > { %2045 = vmatpush3.xpose.msk.msra.mxu0 %vm324_vm2, %v1487_v41  ;;  %2046 = vmatprep.mubr.msk.f32.mxu0 %vm2375_vm0, %v2376_v1 }
 0x3d6   : > { %2071 = vmatprep.subr.bf16.mxu0 %v2374_v0 }
 0x3d7   : > { %v1485_v42 = vpop.permute.xlu1 %1484 }
 0x3d8   : > { %2047 = vmatmul.mubr.msk.f32.vlgmr.msra.gmra.mrb[12].mxu0 %vm324_vm2, %v1485_v42 }
 0x3d9   : > { %2062 = vmatprep.mubr.msk.f32.mxu0 %vm2375_vm0, %v2376_v1 }
 0x3fc   : > { %v894_v43 = vpop.f32.mrb[4].mxu0 }
 0x3fd   : > { %v2008_v44 = vpop.f32.mrb[5].mxu0  ;;  %v898_v59 = vmul.f32 0.5, %v894_v43 }
 0x3ff   : > { %v899_v3 = vsel %vm400_vm3, %v898_v59, -inf }
 0x408   : > { %v735_v45 = vpop.xlane.xlu1 %734 }
 0x409   : > { %v736_v48 = vsub.f32 %v732_v30, %v735_v45 }
 0x40b   : > { %v737_v50 = vmul.f32 1.442695, %v736_v48 }
 0x40d   : > { %2183 = vpow2.f32 %v737_v50 }
 0x417   : > { %v2705_v7 = vpop.eup %2183 }
 0x418   : > { %v739_v11 = vsel %vm400_vm3, %v2705_v7, 0.0 }
 0x49b   : > { %v1060_v46 = vpop.f32.mrb[6].mxu0 }
 0x49c   : > { %v2018_v47 = vpop.f32.mrb[7].mxu0  ;;  %v1064_v63 = vmul.f32 0.5, %v1060_v46 }
 0x49e   : > { %v1065_v10 = vsel %vm400_vm3, %v1064_v63, -inf }
 0x4a0   : > { %v2699_v49 = vpop.f32.mrb[2].mxu1 }
 0x4a1   : > { %v1983_v51 = vpop.f32.mrb[3].mxu1 }
 0x4a3   : > { %v1226_v52 = vpop.f32.mrb[8].mxu0 }
 0x4a4   : > { %v1230_v53 = vmul.f32 0.5, %v1226_v52  ;;  %v562_v54 = vpop.f32.mrb[4].mxu1  ;;  %v2028_v55 = vpop.f32.mrb[9].mxu0 }
 0x4a5   : > { %v566_v56 = vmul.f32 0.5, %v562_v54  ;;  %v1988_v57 = vpop.f32.mrb[5].mxu1 }
 0x4a6   : > { %v1231_v58 = vsel %vm400_vm3, %v1230_v53, -inf }
 0x4a7   : > { %1232 = vmax.xlane.f32.xlu1 %v1231_v58  ;;  %v1392_v60 = vpop.f32.mrb[10].mxu0  ;;  %v567_v61 = vsel %vm400_vm3, %v566_v56, -inf }
 0x4a8   : > { %568 = vmax.xlane.f32.xlu0 %v567_v61  ;;  %v2038_v62 = vpop.f32.mrb[11].mxu0  ;;  %v1396_v8 = vmul.f32 0.5, %v1392_v60 }
 0x4aa   : > { %v1397_v12 = vsel %vm400_vm3, %v1396_v8, -inf }
 0x4ab   : > { %v1558_v2 = vpop.f32.mrb[12].mxu0 }
 0x4ac   : > { %v1562_v4 = vmul.f32 0.5, %v1558_v2  ;;  %900 = vmax.xlane.f32.xlu0 %v899_v3  ;;  %v2048_v5 = vpop.f32.mrb[13].mxu0 }
 0x4ae   : > { %v1563_v6 = vsel %vm400_vm3, %v1562_v4, -inf }
 0x4af   : > { %1564 = vmax.xlane.f32.xlu1 %v1563_v6 }
 0x4b0   : > { %1066 = vmax.xlane.f32.xlu0 %v1065_v10 }
 0x4b3   : > { %740 = vadd.xlane.f32.xlu1 %v739_v11 }
 0x4b4   : > { %1398 = vmax.xlane.f32.xlu0 %v1397_v12 }
 0x534   : > { %v1233_v13 = vpop.xlane.xlu1 %1232 }
 0x535   : > { %v569_v14 = vpop.xlane.xlu0 %568  ;;  %v1234_v15 = vsub.f32 %v1230_v53, %v1233_v13  ;;  %v1690_v13 = vld [vmem:[#allocation7] sm:$0xff] }
 0x536   : > { %v570_v24 = vsub.f32 %v566_v56, %v569_v14  ;;  %v1691_v14 = vld [vmem:[#allocation7 + $0x8] sm:$0xff] }
 0x537   : > { %v1235_v18 = vmul.f32 1.442695, %v1234_v15 }
 0x538   : > { %v571_v29 = vmul.f32 1.442695, %v570_v24 }
 0x539   : > { %v901_v16 = vpop.xlane.xlu0 %900 }
 0x53a   : > { %v902_v17 = vsub.f32 %v898_v59, %v901_v16  ;;  %v2072_v16 = vpack.c.bf16 %v1691_v14, %v1690_v13 }
 0x53c   : > { %v903_v19 = vmul.f32 1.442695, %v902_v17  ;;  %v1565_v20 = vpop.xlane.xlu1 %1564  ;;  %2073 = vmatpush3.bf16.msra.mxu0 %v2072_v16 }
 0x53d   : > { %v1566_v21 = vsub.f32 %v1562_v4, %v1565_v20  ;;  %v1067_v22 = vpop.xlane.xlu0 %1066  ;;  %2074 = vmatprep.subr.bf16.mxu0 %v2374_v0 }
 0x53e   : > { %2185 = vpow2.f32 %v903_v19  ;;  %v1068_v23 = vsub.f32 %v1064_v63, %v1067_v22 }
 0x53f   : > { %2187 = vpow2.f32 %v1235_v18  ;;  %v1567_v25 = vmul.f32 1.442695, %v1566_v21  ;;  %v1693_v18 = vld [vmem:[#allocation7 + $0x18] sm:$0xff] }
 0x540   : > { %v1069_v26 = vmul.f32 1.442695, %v1068_v23  ;;  %v741_v43 = vpop.xlane.xlu1 %740 }
 0x541   : > { %v1399_v27 = vpop.xlane.xlu0 %1398 }
 0x542   : > { %2189 = vpow2.f32 %v1069_v26  ;;  %v1400_v28 = vsub.f32 %v1396_v8, %v1399_v27 }
 0x543   : > { %2191 = vpow2.f32 %v1567_v25 }
 0x544   : > { %v1401_v30 = vmul.f32 1.442695, %v1400_v28 }
 0x546   : > { %2193 = vpow2.f32 %v1401_v30 }
 0x547   : > { %2195 = vpow2.f32 %v571_v29 }
 0x548   : > { %v2711_v31 = vpop.eup %2185 }
 0x549   : > { %v905_v32 = vsel %vm400_vm3, %v2711_v31, 0.0  ;;  %v2715_v33 = vpop.eup %2187 }
 0x54a   : > { %906 = vadd.xlane.f32.xlu0 %v905_v32  ;;  %v1237_v35 = vsel %vm400_vm3, %v2715_v33, 0.0 }
 0x54c   : > { %v2717_v34 = vpop.eup %2189 }
 0x54d   : > { %v1071_v36 = vsel %vm400_vm3, %v2717_v34, 0.0  ;;  %v2723_v37 = vpop.eup %2191 }
 0x54e   : > { %1238 = vadd.xlane.f32.xlu0 %v1237_v35  ;;  %1072 = vadd.xlane.f32.xlu1 %v1071_v36  ;;  %v1569_v40 = vsel %vm400_vm3, %v2723_v37, 0.0 }
 0x550   : > { %v2725_v38 = vpop.eup %2193 }
 0x551   : > { %v1403_v39 = vsel %vm400_vm3, %v2725_v38, 0.0  ;;  %v2196_v41 = vpop.eup %2195 }
 0x552   : > { %1404 = vadd.xlane.f32.xlu1 %v1403_v39  ;;  %1570 = vadd.xlane.f32.xlu0 %v1569_v40  ;;  %v573_v42 = vsel %vm400_vm3, %v2196_v41, 0.0 }
 0x556   : > { %574 = vadd.xlane.f32.xlu0 %v573_v42 }
 0x563   : > { %578 = vrot.lane.b32.xlu1 %v2627_v9, %s2393_s23 }
 0x567   : > { %910 = vrot.lane.b32.xlu1 %v2627_v9, %s2394_s27  ;;  %s1918_s27 = sshll.u32 %s2454_s19, 7 }
 0x56b   : > { %1076 = vrot.lane.b32.xlu1 %v2627_v9, %s2395_s30  ;;  %s241_s30 = scalar_lea.vmem [#allocation8], %s1886_s25  ;;  %s2407_s25 = smov [#allocation8]  }
 0x56c   : > { %744 = vrot.lane.b32.xlu0 %v2627_v9, %s2396_s5  ;;  %s1789_s5 = sshll.u32 %s241_s30, 4  ;;  %s2786_s5 = int_to_ptr.vmem [resolvable:$true] %s1789_s5 }
 0x56d   : > { %s2297_s19 = scalar_lea.vmem %s2786_s5, 128 }
 0x56e   : > { %p2298_p11 = scmp.ne.s32.totalorder %s2786_s5, %s2297_s19 }
 0x56f   : > { %1408 = vrot.lane.b32.xlu1 %v2627_v9, %s2397_s6 }
 0x570   : > { %1242 = vrot.lane.b32.xlu0 %v2627_v9, %s2398_s26  ;;  %p2299_p1 = pnand %p2298_p11, %p2847_p0 }
 0x572   : > { %p2300_p3 = pneg %p2299_p1 }
 0x574   : > { %1574 = vrot.lane.b32.xlu0 %v2627_v9, %s2399_s10  ;;  %s2784_s10 = scalar_lea.hbm %s2833_s4, %s1918_s27 }
 0x5d7   : > { %v907_v44 = vpop.xlane.xlu0 %906 }
 0x5db   : > { %v1239_v45 = vpop.xlane.xlu0 %1238  ;;  %v1073_v46 = vpop.xlane.xlu1 %1072 }
 0x5df   : > { %v1571_v47 = vpop.xlane.xlu0 %1570  ;;  %v1405_v48 = vpop.xlane.xlu1 %1404 }
 0x5e3   : > { %v575_v50 = vpop.xlane.xlu0 %574  ;;  %v579_v51 = vpop.permute.xlu1 %578 }
 0x5e4   : > { %2197 = vrcp.f32 %v575_v50  ;;  %1990 = vmatpush3.msra.mxu1 %v579_v51 }
 0x5e5   : > { %1999 = vmatprep.subr.mxu1 %v2376_v1  ;;  %2199 = vrcp.f32 %v741_v43 }
 0x5e6   : > { %2201 = vrcp.f32 %v907_v44 }
 0x5e7   : > { %2203 = vrcp.f32 %v1073_v46  ;;  %v745_v55 = vpop.permute.xlu0 %744  ;;  %v911_v56 = vpop.permute.xlu1 %910 }
 0x5e8   : > { %2205 = vrcp.f32 %v1239_v45 }
 0x5e9   : > { %2207 = vrcp.f32 %v1405_v48 }
 0x5ea   : > { %2209 = vrcp.f32 %v1571_v47 }
 0x5eb   : > { %v1077_v60 = vpop.permute.xlu1 %1076  ;;  %v1243_v63 = vpop.permute.xlu0 %1242 }
 0x5ee   : > { %v2198_v52 = vpop.eup %2197 }
 0x5ef   : > { %v577_v53 = vmul.f32 %v2198_v52, %v2196_v41  ;;  %v2200_v54 = vpop.eup %2199  ;;  %v1409_v4 = vpop.permute.xlu1 %1408 }
 0x5f0   : > { %v743_v9 = vmul.f32 %v2200_v54, %v2705_v7  ;;  %v2202_v57 = vpop.eup %2201  ;;  %v1575_v7 = vpop.permute.xlu0 %1574 }
 0x5f1   : > { %1992 = vmatmul.mubr.msk.f32.vlgmr.msra.gmra.mrb[6].mxu1 %vm400_vm3, %v577_v53  ;;  %v909_v58 = vmul.f32 %v2202_v57, %v2711_v31  ;;  %v2204_v59 = vpop.eup %2203 }
 0x5f2   : > { %2000 = vmatpush3.msra.mxu1 %v745_v55  ;;  %2001 = vmatprep.mubr.msk.f32.mxu1 %vm2375_vm0, %v2376_v1  ;;  %v1075_v61 = vmul.f32 %v2204_v59, %v2717_v34  ;;  %v2206_v62 = vpop.eup %2205 }
 0x5f3   : > { %2009 = vmatprep.subr.mxu1 %v2376_v1  ;;  %v1241_v2 = vmul.f32 %v2206_v62, %v2715_v33  ;;  %v2208_v3 = vpop.eup %2207 }
 0x5f4   : > { %v1407_v5 = vmul.f32 %v2208_v3, %v2725_v38  ;;  %v2210_v6 = vpop.eup %2209 }
 0x5f5   : > { %2002 = vmatmul.mubr.msk.f32.vlgmr.msra.gmra.mrb[8].mxu1 %vm400_vm3, %v743_v9  ;;  %v1573_v8 = vmul.f32 %v2210_v6, %v2723_v37 }
 0x5f6   : > { %2010 = vmatpush3.msra.mxu1 %v911_v56  ;;  %2011 = vmatprep.mubr.msk.f32.mxu1 %vm2375_vm0, %v2376_v1 }
 0x5f7   : > { %2019 = vmatprep.subr.mxu1 %v2376_v1 }
 0x5f9   : > { %2012 = vmatmul.mubr.msk.f32.vlgmr.msra.gmra.mrb[10].mxu1 %vm400_vm3, %v909_v58 }
 0x5fa   : > { %2020 = vmatpush3.msra.mxu1 %v1077_v60  ;;  %2021 = vmatprep.mubr.msk.f32.mxu1 %vm2375_vm0, %v2376_v1 }
 0x5fb   : > { %2029 = vmatprep.subr.mxu1 %v2376_v1 }
 0x5fd   : > { %2022 = vmatmul.mubr.msk.f32.vlgmr.msra.gmra.mrb[12].mxu1 %vm400_vm3, %v1075_v61 }
 0x5fe   : > { %2030 = vmatpush3.msra.mxu1 %v1243_v63  ;;  %2031 = vmatprep.mubr.msk.f32.mxu1 %vm2375_vm0, %v2376_v1 }
 0x5ff   : > { %2039 = vmatprep.subr.mxu1 %v2376_v1 }
 0x601   : > { %2032 = vmatmul.mubr.msk.f32.vlgmr.msra.gmra.mrb[14].mxu1 %vm400_vm3, %v1241_v2 }
 0x602   : > { %2040 = vmatpush3.msra.mxu1 %v1409_v4  ;;  %2041 = vmatprep.mubr.msk.f32.mxu1 %vm2375_vm0, %v2376_v1 }
 0x603   : > { %2049 = vmatprep.subr.mxu1 %v2376_v1 }
 0x605   : > { %2042 = vmatmul.mubr.msk.f32.vlgmr.msra.gmra.mrb[16].mxu1 %vm400_vm3, %v1407_v5 }
 0x606   : > { %2050 = vmatpush3.msra.mxu1 %v1575_v7  ;;  %2051 = vmatprep.mubr.msk.f32.mxu1 %vm2375_vm0, %v2376_v1  ;;  %v1692_v1 = vld [vmem:[#allocation7 + $0x10] sm:$0xff] }
 0x607   : > { %v2075_v20 = vpack.c.bf16 %v1693_v18, %v1692_v1 }
 0x609   : > { %2052 = vmatmul.mubr.msk.f32.vlgmr.msra.gmra.mrb[18].mxu1 %vm400_vm3, %v1573_v8  ;;  %2076 = vmatpush3.bf16.msra.mxu0 %v2075_v20 }
 0x6c4   : > { %v650_v10 = vpop.f32.mrb[6].mxu1 }
 0x6c5   : > { %1651 = vrot.lane.b32.xlu1 %v650_v10, %s2400_s24  ;;  %v1993_v11 = vpop.f32.mrb[7].mxu1  ;;  %s1776_s24 = scalar_lea.sflag [#allocation4], %s2602_s29 }
 0x6c8   : > { %v816_v12 = vpop.f32.mrb[8].mxu1 }
 0x6c9   : > { %1655 = vrot.lane.b32.xlu0 %v816_v12, %s2401_s20  ;;  %v2003_v15 = vpop.f32.mrb[9].mxu1  ;;  %s2301_s20 = sshll.u32 %s2407_s25, 4  ;;  %s2302_s20 = int_to_ptr.vmem [resolvable:$false] %s2301_s20 }
 0x6ca   : > { %p2304_p7 = scmp.lt.s32.totalorder %s2786_s5, %s2302_s20 }
 0x6cc   : > { %v982_v17 = vpop.f32.mrb[10].mxu1 }
 0x6cd   : > { %1659 = vrot.lane.b32.xlu1 %v982_v17, %s2402_s28  ;;  %v2013_v19 = vpop.f32.mrb[11].mxu1  ;;  %s2303_s28 = scalar_lea.vmem %s2302_s20, 256 }
 0x6ce   : > { %p2305_p9 = scmp.lt.s32.totalorder %s2303_s28, %s2297_s19 }
 0x6d0   : > { %v1148_v21 = vpop.f32.mrb[12].mxu1  ;;  %p2306_p12 = por %p2305_p9, %p2304_p7 }
 0x6d1   : > { %1663 = vrot.lane.b32.xlu0 %v1148_v21, %s2403_s11  ;;  %v2023_v22 = vpop.f32.mrb[13].mxu1 }
 0x6d2   : > { %p2307_p2 = pnand %p2306_p12, %p2300_p3 }
 0x6d4   : > { %v1314_v23 = vpop.f32.mrb[14].mxu1 }
 0x6d5   : > { %1667 = vrot.lane.b32.xlu1 %v1314_v23, %s2404_s12  ;;  %v2033_v24 = vpop.f32.mrb[15].mxu1 }
 0x6d8   : > { %v1480_v25 = vpop.f32.mrb[16].mxu1 }
 0x6d9   : > { %1671 = vrot.lane.b32.xlu0 %v1480_v25, %s2405_s7  ;;  %v2043_v26 = vpop.f32.mrb[17].mxu1 }
 0x6dc   : > { %v1646_v0 = vpop.f32.mrb[18].mxu1 }
 0x6dd   : > { %1675 = vrot.lane.b32.xlu1 %v1646_v0, %s2406_s8  ;;  %v2053_v27 = vpop.f32.mrb[19].mxu1 }
 0x737   : > { %v1652_v28 = vpop.permute.xlu1 %1651 }
 0x738   : > { %v1678_v32 = vsel %vm324_vm2, %v2699_v49, %v1652_v28  ;;  %v1915_v49 = vld [vmem:[%s2832_s3] ss:$0 sm:$0xff] }
 0x73b   : > { %v1656_v29 = vpop.permute.xlu0 %1655 }
 0x73c   : > { %v1679_v33 = vsel %vm400_vm3, %v1678_v32, %v1656_v29 }
 0x73f   : > { %v1660_v30 = vpop.permute.xlu1 %1659 }
 0x740   : > { %v1681_v35 = vsel %vm1680_vm4, %v1679_v33, %v1660_v30 }
 0x743   : > { %v1664_v31 = vpop.permute.xlu0 %1663 }
 0x744   : > { %v1683_v37 = vsel %vm1682_vm5, %v1681_v35, %v1664_v31 }
 0x747   : > { %v1668_v34 = vpop.permute.xlu1 %1667 }
 0x748   : > { %v1685_v38 = vsel %vm1684_vm6, %v1683_v37, %v1668_v34 }
 0x74b   : > { %v1672_v36 = vpop.permute.xlu0 %1671 }
 0x74c   : > { %v1687_v39 = vsel %vm1686_vm7, %v1685_v38, %v1672_v36 }
 0x74f   : > { %v1676_v40 = vpop.permute.xlu1 %1675 }
 0x750   : > { %v1689_v41 = vsel %vm1688_vm8, %v1687_v39, %v1676_v40 }
 0x751   : > { %2063 = vmatmul.mubr.msk.f32.vlgmr.msra.gmra.mrb[14].mxu0 %vm247_vm1, %v1689_v41 }
 0x824   : > { %v1770_v42 = vpop.f32.mrb[14].mxu0 }
 0x825   : > { %v1771_v43 = vadd.f32 %v1915_v49, %v1770_v42  ;;  %v2064_v44 = vpop.f32.mrb[15].mxu0 }
 0x827   : > { %1774 = vst.msk [vmem:[%s241_s30] sm:$0xff] %vm247_vm1, %v1771_v43 }
 0x828   : > { %2310 = shalt.err (!%p2307_p2)
}
 0x829   : > { %s2311_s29 = scalar_lea.hbm %s2784_s10, 128  ;;  %s2315_s7 = scalar_lea.hbm %s2833_s4, 256 }
 0x82a   : > { %p2312_p13 = scmp.ne.s32.totalorder %s2784_s10, %s2311_s29  ;;  %p2316_p4 = scmp.lt.u32.totalorder %s2784_s10, %s2833_s4 }
 0x82b   : > { %p2317_p5 = scmp.lt.u32.totalorder %s2315_s7, %s2311_s29  ;;  %p2319_p11 = scmp.lt.u32.totalorder %s2311_s29, %s2784_s10 }
 0x82c   : > { %p2313_p6 = pnand %p2312_p13, %p2847_p0 }
 0x82d   : > { %p2318_p8 = por %p2317_p5, %p2316_p4 }
 0x82e   : > { %p2314_p10 = pneg %p2313_p6 }
 0x82f   : > { %p2320_p1 = por %p2319_p11, %p2318_p8 }
 0x831   : > { %p2321_p3 = pnand %p2320_p1, %p2314_p10 }
 0x833   : > { %2324 = shalt.err (!%p2321_p3)
}
 0x834   : > { %2087 = dma.vmem_to_hbm [thread:$0]  (%p2847_p0), %s2786_s5, 128, %s2784_s10, %s1776_s24  }
 0x835 PF: > { %s1801_s23 = sand.u32 1, %s2355_s15   ;;  %p2848_p7 = scmp.ne.s32.totalorder %s2838_s22, 0 }
 0x836   : > { %p2849_p9 = scmp.ge.s32.totalorder %s2367_s18, 2  ;;  %s1802_s27 = scalar_lea.sflag [#allocation4], %s1801_s23 }
 0x838   : > { %p2101_p12 = pnand %p2849_p9, %p2848_p7 }
 0x83a   : > { %2350 = dma.done.wait (!%p2101_p12), %s1802_s27, 128  }
 0x83b   : > { %2352 = vsyncadd (!%p2101_p12), %s1802_s27, 4294967168  ;;  %p18_p2 = scmp.ge.s32.totalorder %s2543_s9, 4   ;;  %s2850_s15 = smov %s2359_s16 }
 0x83c   : > { %s2851_s16 = smov %s2363_s17  ;;  %s2852_s17 = smov %s2559_s14 }
 0x83d   : > { %s2853_s18 = smov %s2543_s9  ;;  %20 = sbr.rel (!%p18_p2) target bundleno = 6 (0x6), region = 89 }
 0x844   :  { %1807 = vsyncpa [#allocation3], 1 }
 0x845   :  { %1809 = vsyncpa [#allocation3 + $0x1], 1 }
 0x846   :  { %1810 = vsyncpa [#allocation6], 1 }
 0x847   :  { %1811 = vsyncpa [#allocation4], 1 }
 0x848   :  { %1813 = vsyncpa [#allocation4 + $0x1], 1 }

</bundles_post_ra>
